<compile_context>
chip_gen: v6e
topology: v6e:2x2x1
jax: 0.10.0
libtpu: 0.0.40
codegen_flags: <defaults>
</compile_context>

<pallas_src>
import jax
import jax.numpy as jnp
import numpy as np
from jax.experimental import pallas as pl
from jax.experimental.pallas import tpu as pltpu


# ---------------------------------------------------------------------------
# Kernels
# ---------------------------------------------------------------------------
def _pool_kernel(x_ref, r_ref, o_ref):
    """x:(TR, TK) native dtype, r:(TK, Cp) f32, o:(TR, Cp) f32 accumulated over K."""
    @pl.when(pl.program_id(1) == 0)
    def _():
        o_ref[...] = jnp.zeros_like(o_ref)

    o_ref[...] += jnp.dot(x_ref[...].astype(jnp.float32), r_ref[...],
                          preferred_element_type=jnp.float32)


def _mask_kernel(tau_ref, p_ref, w1t_ref, b1_ref, a1_ref, w2t_ref, b2_ref, a2_ref,
                 u_ref, mask_ref):
    """Two 1x1 convs + PReLUs + custom gumbel softmax on the tiny (B, Cin) pooled vec."""
    pooled = p_ref[...]                                               # (B, Cin)

    h = jnp.dot(pooled, w1t_ref[...],
                preferred_element_type=jnp.float32) + b1_ref[...]
    h = jnp.where(h >= 0.0, h, a1_ref[...] * h)                       # PReLU

    z = jnp.dot(h, w2t_ref[...],
                preferred_element_type=jnp.float32) + b2_ref[...]
    z = jnp.where(z >= 0.0, z, a2_ref[...] * z)                       # PReLU

    # module's custom gumbel_softmax: softmax(z) -> add gumbel -> /tau -> softmax
    z = z - jnp.max(z, axis=-1, keepdims=True)
    e = jnp.exp(z)
    p = e / jnp.sum(e, axis=-1, keepdims=True)

    g = -jnp.log(-jnp.log(u_ref[...]))
    y = (p + g) / tau_ref[...]                                        # (1,1) broadcast
    y = y - jnp.max(y, axis=-1, keepdims=True)
    ey = jnp.exp(y)
    mask_ref[...] = ey / jnp.sum(ey, axis=-1, keepdims=True)


def _wsum_kernel(x_ref, w_ref, o_ref):
    """x:(TB*O, TN) native dtype, w:(TB, TB*O) block-diag mask (f32), o:(TB, TN)."""
    o_ref[...] = jnp.dot(w_ref[...], x_ref[...].astype(jnp.float32),
                         preferred_element_type=jnp.float32).astype(o_ref.dtype)


# ---------------------------------------------------------------------------
# Tile / budget helpers
# ---------------------------------------------------------------------------
def _round_up(x, m):
    return ((x + m - 1) // m) * m


def _largest_divisor_leq(n, cap):
    cap = max(1, min(n, cap))
    best, d = 1, 1
    while d * d <= n:
        if n % d == 0:
            if d <= cap:
                best = max(best, d)
            q = n // d
            if q <= cap:
                best = max(best, q)
        d += 1
    return best


def _vmem_limit_bytes():
    """Scoped VMEM request: generous, but with headroom on every generation."""
    try:
        cap = int(pltpu.get_tpu_info().vmem_capacity_bytes)
    except Exception:
        cap = 64 << 20                       # conservative (v7x-sized) fallback
    return max(16 << 20, min(cap // 2, 32 << 20))


def _pool_tiles(rows, K, x_bytes, cp, budget):
    """Row tile (sublane) and K tile (lane) for the pooling pass."""
    if rows % 8 == 0:
        tr = 8
        # grow the row tile but keep >=2 programs on the 'parallel' axis (v7x megacore)
        while tr * 2 <= 256 and rows % (tr * 2) == 0 and rows // (tr * 2) >= 2:
            tr *= 2
    else:
        tr = rows   # full extent satisfies the (8,128) rule
        # TODO(synk): pad rows to a multiple of 8 for very large, non-8-divisible rows.

    def fits(tk):
        x_tile = tr * tk * x_bytes * 2       # double-buffered x stream
        r_tile = tk * cp * 4 * 2             # rmat2 block (double-buffered)
        acc = tr * cp * 4 * 2                # accumulator / output block
        return x_tile + r_tile + acc <= budget

    if fits(K):                              # whole K extent: rmat2 streamed exactly once
        return tr, K

    tk, t = 0, 128
    while t <= K:
        if not fits(t):
            break
        if K % t == 0:
            tk = t
        t += 128
    if tk == 0:
        cap = max(1, (budget - tr * cp * 8) // (tr * x_bytes * 2 + cp * 8))
        tk = _largest_divisor_leq(K, cap)
        # TODO(synk): pad K to a 128-multiple for pathological shapes with no divisor.
    return tr, tk


def _wsum_tiles(B, O, N, x_bytes, budget):
    tb = 8 if B % 8 == 0 else B
    # TODO(synk): pad B to a multiple of 8 for large batch sizes not divisible by 8.
    per_lane = tb * O * x_bytes * 2 + tb * max(x_bytes, 4) * 2   # x stream + output
    fixed = tb * tb * O * 4 * 2                                  # block-diag mask slab
    cap = max(128, (budget - fixed) // per_lane)
    if N <= cap:
        return tb, N
    tn, t = 0, 128
    while t <= min(N, cap):
        if N % t == 0:
            tn = t
        t += 128
    if tn == 0:
        tn = _largest_divisor_leq(N, cap)
        # TODO(synk): pad N to a 128-multiple when it has no usable divisor under cap.
    return tb, tn


# ---------------------------------------------------------------------------
# Wrapper
# ---------------------------------------------------------------------------
def gumble_block_2d_all_pooling(x, params, u, *, outchannel, tau=1.0,
                                test_flag=False):
    W1, b1, a1, W2, b2, a2 = params
    B, d1, d2, d3, d4, d5 = x.shape
    Cin = d1 * d5 * d3
    O = outchannel
    assert (d1 * d4 * d5) % O == 0
    G = (d1 * d4 * d5) // O
    N = G * d2 * d3
    L = d3 * d4 * d5
    C = d5 * d3
    K = d2 * L
    rows = B * d1
    assert W1.shape == (Cin, Cin) and W2.shape == (O, Cin)

    x_bytes = jnp.dtype(x.dtype).itemsize
    vmem_limit = _vmem_limit_bytes()
    tile_budget = int(vmem_limit * 0.7)      # streamed-tile budget (double-buffered)

    # ---- stage 1: adaptive avg-pool, native layout, lane-dense flattened view ----
    # pooled channel order must be (d1, d5, d3) to match torch's permute(0,1,5,3,4,2).
    Cp = _round_up(C, 128)
    if K * Cp * 4 > (8 << 20):               # don't blow up rmat2 for huge K
        Cp = C
    # rmat[(i3,i4,i5), (i5',i3')] = [i3==i3'][i5==i5'] / (d2*d4)
    rmat = (jnp.eye(d5, dtype=jnp.float32)[None, None, :, :, None] *
            jnp.eye(d3, dtype=jnp.float32)[:, None, None, None, :])
    rmat = jnp.broadcast_to(rmat, (d3, d4, d5, d5, d3)).reshape(L, C)
    rmat = rmat / jnp.float32(d2 * d4)
    rmat2 = jnp.tile(rmat, (d2, 1))                          # fold the d2 sum into K
    if Cp > C:
        rmat2 = jnp.pad(rmat2, ((0, 0), (0, Cp - C)))        # lane-dense output columns

    x_rows = x.reshape(rows, K)              # pure row-major view (no copy), native dtype
    TR, TK = _pool_tiles(rows, K, x_bytes, Cp, tile_budget)

    pooled_rows = pl.pallas_call(
        _pool_kernel,
        out_shape=jax.ShapeDtypeStruct((rows, Cp), jnp.float32),
        grid=(rows // TR, K // TK),
        in_specs=[
            pl.BlockSpec((TR, TK), lambda i, k: (i, k)),
            pl.BlockSpec((TK, Cp), lambda i, k: (k, 0)),     # constant across row tiles
        ],
        out_specs=pl.BlockSpec((TR, Cp), lambda i, k: (i, 0)),   # accumulator block
        compiler_params=pltpu.CompilerParams(
            dimension_semantics=("parallel", "arbitrary"),
            vmem_limit_bytes=vmem_limit),
    )(x_rows, rmat2)

    pooled = pooled_rows[:, :C].reshape(B, Cin)              # (d1, d5, d3) channel order

    # ---- stage 2: tiny MLP + gumbel softmax -> mask (B, O) ----
    tau_arr = jnp.asarray(tau, jnp.float32).reshape(1, 1)
    a1_row = jnp.broadcast_to(jnp.asarray(a1, jnp.float32).reshape(-1), (Cin,)).reshape(1, Cin)
    a2_row = jnp.broadcast_to(jnp.asarray(a2, jnp.float32).reshape(-1), (O,)).reshape(1, O)

    mask = pl.pallas_call(
        _mask_kernel,
        out_shape=jax.ShapeDtypeStruct((B, O), jnp.float32),
        grid=(1,),
        in_specs=[
            pl.BlockSpec((1, 1), lambda i: (0, 0)),          # tau
            pl.BlockSpec((B, Cin), lambda i: (0, 0)),        # pooled
            pl.BlockSpec((Cin, Cin), lambda i: (0, 0)),      # W1^T
            pl.BlockSpec((1, Cin), lambda i: (0, 0)),        # b1
            pl.BlockSpec((1, Cin), lambda i: (0, 0)),        # PReLU slope 1
            pl.BlockSpec((Cin, O), lambda i: (0, 0)),        # W2^T
            pl.BlockSpec((1, O), lambda i: (0, 0)),          # b2
            pl.BlockSpec((1, O), lambda i: (0, 0)),          # PReLU slope 2
            pl.BlockSpec((B, O), lambda i: (0, 0)),          # gumbel uniform noise
        ],
        out_specs=pl.BlockSpec((B, O), lambda i: (0, 0)),
    )(tau_arr, pooled,
      W1.T.astype(jnp.float32), b1.reshape(1, Cin).astype(jnp.float32), a1_row,
      W2.T.astype(jnp.float32), b2.reshape(1, O).astype(jnp.float32), a2_row,
      u.astype(jnp.float32))

    if test_flag:
        # torch argmax + scatter_ one-hot, done as XLA glue on the tiny (B, O) mask
        mask = jax.nn.one_hot(jnp.argmax(mask, axis=1), O, dtype=jnp.float32)

    # ---- stage 3: weighted sum over the O groups (hot, mem-bound) ----
    TB, TN = _wsum_tiles(B, O, N, x_bytes, tile_budget)
    nb = B // TB

    # fold the mask into a per-batch-tile block-diagonal weight: the O-reduction then
    # runs on the MXU over fully dense (TB*O, TN) x tiles (no O<8 sublane padding).
    m3 = mask.reshape(nb, TB, O)
    wdiag = (jnp.eye(TB, dtype=jnp.float32)[None, :, :, None] * m3[:, None, :, :])
    wdiag = wdiag.reshape(nb, TB, TB * O)

    x_flat = x.reshape(B * O, N)             # pure row-major view (== torch .view)

    input_conv = pl.pallas_call(
        _wsum_kernel,
        out_shape=jax.ShapeDtypeStruct((B, N), x.dtype),
        grid=(nb, N // TN),
        in_specs=[
            pl.BlockSpec((TB * O, TN), lambda b, n: (b, n)),
            pl.BlockSpec((None, TB, TB * O), lambda b, n: (b, 0, 0)),  # per-batch tile only
        ],
        out_specs=pl.BlockSpec((TB, TN), lambda b, n: (b, n)),
        compiler_params=pltpu.CompilerParams(
            dimension_semantics=("parallel", "parallel"),
            vmem_limit_bytes=vmem_limit),
    )(x_flat, wdiag)

    return input_conv.reshape(B, G, d2, d3), mask.reshape(B, O, 1, 1, 1)


# ---------------------------------------------------------------------------
# Pure-JAX reference (mirror of the torch forward, same gumbel noise u)
# ---------------------------------------------------------------------------
def _reference(x, params, u, O, tau, test_flag):
    W1, b1, a1, W2, b2, a2 = params
    B, d1, d2, d3, d4, d5 = x.shape
    xp = jnp.transpose(x, (0, 1, 5, 3, 4, 2))
    pooled = jnp.mean(xp, axis=(-2, -1)).reshape(B, -1)
    h = pooled @ W1.T + b1
    h = jnp.where(h >= 0, h, a1 * h)
    z = h @ W2.T + b2
    z = jnp.where(z >= 0, z, a2 * z)
    p = jax.nn.softmax(z, axis=1)
    g = -jnp.log(-jnp.log(u))
    m = jax.nn.softmax((p + g) / tau, axis=1)
    if test_flag:
        m = jax.nn.one_hot(jnp.argmax(m, axis=1), O, dtype=jnp.float32)
    out = x.reshape(B, O, -1, d2, d3)
    conv = jnp.sum(out * m[:, :, None, None, None], axis=1)
    return conv, m.reshape(B, O, 1, 1, 1)


if __name__ == "__main__":
    # x: (B, d1, d2, d3, d4, d5);  inchannel = d1*d5*d3;  outchannel divides d1*d4*d5
    B, d1, d2, d3, d4, d5 = 2, 2, 8, 8, 2, 3
    O = 4
    Cin = d1 * d5 * d3                      # 48
    tau = 1.0

    key = jax.random.PRNGKey(0)
    kx, k1, k2, k3, k4, ku = jax.random.split(key, 6)
    x = jax.random.normal(kx, (B, d1, d2, d3, d4, d5), jnp.float32)

    # deterministic synthetic parameters (1x1 Conv2d weights == dense matrices)
    W1 = jax.random.normal(k1, (Cin, Cin), jnp.float32) * (1.0 / np.sqrt(Cin))
    b1 = jax.random.normal(k2, (Cin,), jnp.float32) * 0.05
    W2 = jax.random.normal(k3, (O, Cin), jnp.float32) * (1.0 / np.sqrt(Cin))
    b2 = jax.random.normal(k4, (O,), jnp.float32) * 0.05
    a1 = a2 = 0.25                          # nn.PReLU() default init
    params = (W1, b1, a1, W2, b2, a2)

    # gumbel uniform noise, strictly inside (0, 1)
    u = jax.random.uniform(ku, (B, O), jnp.float32, minval=1e-6, maxval=1.0)

    # ---- f32 path: soft + hard masks, strict check ----
    conv_soft, mask_soft = gumble_block_2d_all_pooling(
        x, params, u, outchannel=O, tau=tau, test_flag=False)
    conv_hard, mask_hard = gumble_block_2d_all_pooling(
        x, params, u, outchannel=O, tau=tau, test_flag=True)
    jax.block_until_ready((conv_soft, mask_soft, conv_hard, mask_hard))

    ref_cs, ref_ms = _reference(x, params, u, O, tau, False)
    ref_ch, ref_mh = _reference(x, params, u, O, tau, True)
    np.testing.assert_allclose(np.asarray(conv_soft), np.asarray(ref_cs),
                               rtol=1e-4, atol=1e-4)
    np.testing.assert_allclose(np.asarray(mask_soft), np.asarray(ref_ms),
                               rtol=1e-4, atol=1e-5)
    np.testing.assert_allclose(np.asarray(conv_hard), np.asarray(ref_ch),
                               rtol=1e-4, atol=1e-4)
    np.testing.assert_allclose(np.asarray(mask_hard), np.asarray(ref_mh),
                               rtol=1e-4, atol=1e-5)

    # ---- bf16 path: x streamed in native bf16 (no f32 HBM copy), bf16 output ----
    x_bf16 = x.astype(jnp.bfloat16)
    conv_b, mask_b = gumble_block_2d_all_pooling(
        x_bf16, params, u, outchannel=O, tau=tau, test_flag=False)
    jax.block_until_ready((conv_b, mask_b))
    ref_cb, ref_mb = _reference(x_bf16.astype(jnp.float32), params, u, O, tau, False)
    np.testing.assert_allclose(np.asarray(conv_b.astype(jnp.float32)),
                               np.asarray(ref_cb), rtol=2e-2, atol=2e-2)
    np.testing.assert_allclose(np.asarray(mask_b), np.asarray(ref_mb),
                               rtol=1e-3, atol=1e-3)

    print("KERNEL_OK")
</pallas_src>

<mosaic_0001>
module attributes {stable_mosaic.version = 11 : i64} {
  func.func @_pool_kernel(%arg0: i32, %arg1: i32, %arg2: memref<4x384xf32, #tpu.memory_space<vmem>>, %arg3: memref<384x128xf32, #tpu.memory_space<vmem>>, %arg4: memref<4x128xf32, #tpu.memory_space<vmem>>) attributes {dimension_semantics = [#tpu.dimension_semantics<parallel>, #tpu.dimension_semantics<arbitrary>], iteration_bounds = array<i64: 1, 1>, scalar_prefetch = 0 : i64, scratch_operands = 0 : i64, tpu.core_type = #tpu.core_type<tc>, window_params = [{transform_indices = @transform_0, window_bounds = array<i64: 4, 384>}, {transform_indices = @transform_1, window_bounds = array<i64: 384, 128>}, {transform_indices = @transform_2, window_bounds = array<i64: 4, 128>}]} {
    %c0_i32 = arith.constant 0 : i32
    %0 = arith.cmpi eq, %arg1, %c0_i32 : i32
    %1 = arith.extui %0 : i1 to i32
    %c0_i32_0 = arith.constant 0 : i32
    %2 = arith.cmpi ne, %1, %c0_i32_0 : i32
    scf.if %2 {
      %cst_8 = arith.constant 0.000000e+00 : f32
      %9 = vector.broadcast %cst_8 : f32 to vector<4x128xf32>
      %c0_9 = arith.constant 0 : index
      %c0_10 = arith.constant 0 : index
      %10 = vector.load %arg4[%c0_9, %c0_10] : memref<4x128xf32, #tpu.memory_space<vmem>>, vector<4x128xf32>
      tpu.vector_store %arg4[%c0_9, %c0_10], %9 {strides = array<i32>} : memref<4x128xf32, #tpu.memory_space<vmem>>, vector<4x128xf32>,
    } else {
    }
    %c0 = arith.constant 0 : index
    %c0_1 = arith.constant 0 : index
    %3 = vector.load %arg4[%c0, %c0_1] : memref<4x128xf32, #tpu.memory_space<vmem>>, vector<4x128xf32>
    %c0_2 = arith.constant 0 : index
    %c0_3 = arith.constant 0 : index
    %4 = vector.load %arg2[%c0_2, %c0_3] : memref<4x384xf32, #tpu.memory_space<vmem>>, vector<4x384xf32>
    %c0_4 = arith.constant 0 : index
    %c0_5 = arith.constant 0 : index
    %5 = vector.load %arg3[%c0_4, %c0_5] : memref<384x128xf32, #tpu.memory_space<vmem>>, vector<384x128xf32>
    %cst = arith.constant dense<0.000000e+00> : vector<4x128xf32>
    %6 = tpu.matmul %4, %5, %cst {dimension_numbers = #tpu.dot_dimension_numbers<[1], [0], [0], [1], [0, 0, 1, 1], [], []>} : vector<4x384xf32>, vector<384x128xf32>, vector<4x128xf32> -> vector<4x128xf32>
    %7 = arith.addf %3, %6 : vector<4x128xf32>
    %c0_6 = arith.constant 0 : index
    %c0_7 = arith.constant 0 : index
    %8 = vector.load %arg4[%c0_6, %c0_7] : memref<4x128xf32, #tpu.memory_space<vmem>>, vector<4x128xf32>
    tpu.vector_store %arg4[%c0_6, %c0_7], %7 {strides = array<i32>} : memref<4x128xf32, #tpu.memory_space<vmem>>, vector<4x128xf32>,
    return
  }
  func.func @transform_0(%arg0: i32, %arg1: i32) -> (i32, i32) {
    %c0_i32 = arith.constant 0 : i32
    return %arg0, %arg1 : i32, i32
  }
  func.func @transform_1(%arg0: i32, %arg1: i32) -> (i32, i32) {
    %c0_i32 = arith.constant 0 : i32
    %c0_i32_0 = arith.constant 0 : i32
    return %arg1, %c0_i32 : i32, i32
  }
  func.func @transform_2(%arg0: i32, %arg1: i32) -> (i32, i32) {
    %c0_i32 = arith.constant 0 : i32
    %c0_i32_0 = arith.constant 0 : i32
    return %arg0, %c0_i32 : i32, i32
  }
}

</mosaic_0001>

<bundles_post_ra>
// kernel: tpu_custom_call.1
= control target key start
LH: loop header
LB: loop body
LE: loop exit
PB: predicated region body
PF: predicated region fallthrough
CT: control target
= control target key end

     0   :  { %7 = vsyncpa [#allocation3], 0  ;;  %s465_s0 = inlined_call_operand.hbm [shape: f32[4,384], index: 0, kind: input, shape index: {}]   ;;  %s466_s1 = inlined_call_operand.hbm [shape: f32[384,128], index: 1, kind: input, shape index: {}]   ;;  %s467_s2 = inlined_call_operand.hbm [shape: f32[4,128], index: 2, kind: output, shape index: {}]  }
   0x1   :  { %8 = vsyncpa [#allocation6], 0 }
   0x2   :  { %9 = vsyncpa [#allocation4], 0  ;;  %s416_s9 = smov [#allocation2]   ;;  %s417_s11 = smov [#allocation5]  }
   0x3   :  { %s16_s10 = sshll.u32 %s416_s9, 4  ;;  %s25_s12 = sshll.u32 %s417_s11, 4  ;;  %s17_s10 = int_to_ptr.vmem [resolvable:$true] %s16_s10  ;;  %s26_s12 = int_to_ptr.vmem [resolvable:$true] %s25_s12 }
   0x4   :  { %s358_s13 = scalar_lea.vmem %s17_s10, 192  ;;  %p363_p1 = scmp.lt.s32.totalorder %s17_s10, %s17_s10 }
   0x5   :  { %p359_p0 = scmp.ne.s32.totalorder %s17_s10, %s358_s13  ;;  %p364_p2 = scmp.lt.s32.totalorder %s358_s13, %s358_s13 }
   0x7   :  { %p365_p3 = por %p364_p2, %p363_p1 }
   0x9   :  { %p366_p4 = pnand %p365_p3, %p359_p0 }
   0xb   :  { %369 = shalt.err (!%p366_p4)
}
   0xc   :  { %19 = dma.hbm_to_vmem [thread:$0]  %s465_s0, 192, %s17_s10, [#allocation3]  }
   0xd   :  { %s378_s16 = scalar_lea.vmem %s26_s12, 6144  ;;  %p383_p6 = scmp.lt.s32.totalorder %s26_s12, %s26_s12 }
   0xe   :  { %p379_p5 = scmp.ne.s32.totalorder %s26_s12, %s378_s16  ;;  %p384_p7 = scmp.lt.s32.totalorder %s378_s16, %s378_s16 }
  0x10   :  { %p385_p8 = por %p384_p7, %p383_p6 }
  0x12   :  { %p386_p9 = pnand %p385_p8, %p379_p5 }
  0x14   :  { %389 = shalt.err (!%p386_p9)
}
  0x15   :  { %s418_s17 = smov 128   ;;  %s419_s18 = smov 8  }
  0x16   :  { %31 = dma.hbm_to_vmem [thread:$0]  %s466_s1, 6144, %s26_s12, [#allocation6], %s418_s17, %s418_s17, %s419_s18  }
  0x17   :  { %410 = dma.done.wait [#allocation3], 192  }
  0x18   :  { %411 = vsyncadd [#allocation3], 4294967104 }
  0x19   :  { %412 = dma.done.wait [#allocation6], 6144  }
  0x1a   :  { %413 = vsyncadd [#allocation6], 4294961152  ;;  %v420_v0 = vmov 0.0   ;;  %vm421_vm0 = vmmov 0   ;;  %v77_v1 = vld [vmem:[#allocation5 + $0xf8] sm:$0xff]  ;;  %v76_v3 = vld [vmem:[#allocation5 + $0xf0] sm:$0xff] }
  0x1b   :  { %307 = vmatprep.subr.mxu1 %v420_v0  ;;  %42 = vst [vmem:[#allocation7] sm:$0xf] %v420_v0  ;;  %339 = vmatprep.mubr.msk.f32.mxu1 %vm421_vm0, %v420_v0  ;;  %v61_v2 = vld [vmem:[#allocation5 + $0x78] sm:$0xff]  ;;  %v60_v4 = vld [vmem:[#allocation5 + $0x70] sm:$0xff]  ;;  %v75_v6 = vld [vmem:[#allocation5 + $0xe8] sm:$0xff]  ;;  %s422_s0 = smov [#allocation7]  }
  0x1c   :  { %255 = vmatprep.subr.mxu0 %v77_v1  ;;  %v93_v5 = vld [vmem:[#allocation5 + $0x178] sm:$0xff]  ;;  %v92_v7 = vld [vmem:[#allocation5 + $0x170] sm:$0xff]  ;;  %v59_v8 = vld [vmem:[#allocation5 + $0x68] sm:$0xff]  ;;  %s245_s1 = sshll.u32 %s422_s0, 4  ;;  %s246_s1 = int_to_ptr.vmem [resolvable:$true] %s245_s1 }
  0x1d   :  { %256 = vmatpush3.msra.mxu0 %v61_v2  ;;  %308 = vmatpush3.msra.mxu1 %v93_v5  ;;  %v91_v9 = vld [vmem:[#allocation5 + $0x168] sm:$0xff]  ;;  %v74_v10 = vld [vmem:[#allocation5 + $0xe0] sm:$0xff]  ;;  %v73_v13 = vld [vmem:[#allocation5 + $0xd8] sm:$0xff]  ;;  %s390_s21 = scalar_lea.vmem %s246_s1, 64  ;;  %p395_p11 = scmp.lt.s32.totalorder %s246_s1, %s246_s1 }
  0x1e   :  { %257 = vmatprep.subr.mxu0 %v76_v3  ;;  %309 = vmatprep.subr.mxu1 %v420_v0  ;;  %v58_v11 = vld [vmem:[#allocation5 + $0x60] sm:$0xff]  ;;  %v57_v14 = vld [vmem:[#allocation5 + $0x58] sm:$0xff]  ;;  %v72_v16 = vld [vmem:[#allocation5 + $0xd0] sm:$0xff]  ;;  %p391_p10 = scmp.ne.s32.totalorder %s246_s1, %s390_s21  ;;  %p396_p12 = scmp.lt.s32.totalorder %s390_s21, %s390_s21 }
  0x1f   :  { %258 = vmatpush3.msra.mxu0 %v60_v4  ;;  %310 = vmatpush3.msra.mxu1 %v92_v7  ;;  %v90_v12 = vld [vmem:[#allocation5 + $0x160] sm:$0xff]  ;;  %v89_v15 = vld [vmem:[#allocation5 + $0x158] sm:$0xff]  ;;  %v56_v17 = vld [vmem:[#allocation5 + $0x50] sm:$0xff] }
  0x20   :  { %259 = vmatprep.subr.mxu0 %v75_v6  ;;  %311 = vmatprep.subr.mxu1 %v420_v0  ;;  %v88_v18 = vld [vmem:[#allocation5 + $0x150] sm:$0xff]  ;;  %v71_v19 = vld [vmem:[#allocation5 + $0xc8] sm:$0xff]  ;;  %v70_v22 = vld [vmem:[#allocation5 + $0xc0] sm:$0xff]  ;;  %p397_p13 = por %p396_p12, %p395_p11 }
  0x21   :  { %260 = vmatpush3.msra.mxu0 %v59_v8  ;;  %312 = vmatpush3.msra.mxu1 %v91_v9  ;;  %v55_v20 = vld [vmem:[#allocation5 + $0x48] sm:$0xff]  ;;  %v54_v23 = vld [vmem:[#allocation5 + $0x40] sm:$0xff]  ;;  %v69_v25 = vld [vmem:[#allocation5 + $0xb8] sm:$0xff] }
  0x22   :  { %261 = vmatprep.subr.mxu0 %v74_v10  ;;  %313 = vmatprep.subr.mxu1 %v420_v0  ;;  %v87_v21 = vld [vmem:[#allocation5 + $0x148] sm:$0xff]  ;;  %v86_v24 = vld [vmem:[#allocation5 + $0x140] sm:$0xff]  ;;  %v53_v26 = vld [vmem:[#allocation5 + $0x38] sm:$0xff]  ;;  %p398_p0 = pnand %p397_p13, %p391_p10 }
  0x23   :  { %262 = vmatpush3.msra.mxu0 %v58_v11  ;;  %314 = vmatpush3.msra.mxu1 %v90_v12  ;;  %v85_v27 = vld [vmem:[#allocation5 + $0x138] sm:$0xff]  ;;  %v68_v28 = vld [vmem:[#allocation5 + $0xb0] sm:$0xff]  ;;  %v67_v31 = vld [vmem:[#allocation5 + $0xa8] sm:$0xff] }
  0x24   :  { %263 = vmatprep.subr.mxu0 %v73_v13  ;;  %315 = vmatprep.subr.mxu1 %v420_v0  ;;  %v52_v29 = vld [vmem:[#allocation5 + $0x30] sm:$0xff]  ;;  %v51_v32 = vld [vmem:[#allocation5 + $0x28] sm:$0xff]  ;;  %v66_v34 = vld [vmem:[#allocation5 + $0xa0] sm:$0xff] }
  0x25   :  { %264 = vmatpush3.msra.mxu0 %v57_v14  ;;  %316 = vmatpush3.msra.mxu1 %v89_v15  ;;  %v84_v30 = vld [vmem:[#allocation5 + $0x130] sm:$0xff]  ;;  %v83_v33 = vld [vmem:[#allocation5 + $0x128] sm:$0xff]  ;;  %v50_v35 = vld [vmem:[#allocation5 + $0x20] sm:$0xff] }
  0x26   :  { %265 = vmatprep.subr.mxu0 %v72_v16  ;;  %317 = vmatprep.subr.mxu1 %v420_v0  ;;  %v82_v36 = vld [vmem:[#allocation5 + $0x120] sm:$0xff]  ;;  %v65_v37 = vld [vmem:[#allocation5 + $0x98] sm:$0xff]  ;;  %v64_v41 = vld [vmem:[#allocation5 + $0x90] sm:$0xff] }
  0x27   :  { %266 = vmatpush3.msra.mxu0 %v56_v17  ;;  %318 = vmatpush3.msra.mxu1 %v88_v18  ;;  %v49_v38 = vld [vmem:[#allocation5 + $0x18] sm:$0xff]  ;;  %v48_v42 = vld [vmem:[#allocation5 + $0x10] sm:$0xff]  ;;  %v63_v44 = vld [vmem:[#allocation5 + $0x88] sm:$0xff] }
  0x28   :  { %267 = vmatprep.subr.mxu0 %v71_v19  ;;  %319 = vmatprep.subr.mxu1 %v420_v0  ;;  %v81_v39 = vld [vmem:[#allocation5 + $0x118] sm:$0xff]  ;;  %v80_v43 = vld [vmem:[#allocation5 + $0x110] sm:$0xff]  ;;  %v47_v46 = vld [vmem:[#allocation5 + $0x8] sm:$0xff] }
  0x29   :  { %268 = vmatpush3.msra.mxu0 %v55_v20  ;;  %320 = vmatpush3.msra.mxu1 %v87_v21  ;;  %v44_v40 = vld [vmem:[#allocation2] sm:$0xff]  ;;  %v62_v47 = vld [vmem:[#allocation5 + $0x80] sm:$0xff]  ;;  %v79_v48 = vld [vmem:[#allocation5 + $0x108] sm:$0xff] }
  0x2a   :  { %269 = vmatprep.subr.mxu0 %v70_v22  ;;  %321 = vmatprep.subr.mxu1 %v420_v0  ;;  %v95_v45 = vcombine.high %v44_v40, %v44_v40  ;;  %v46_v49 = vld [vmem:[#allocation5] sm:$0xff]  ;;  %v45_v51 = vld [vmem:[#allocation2 + $0x8] sm:$0xf] }
  0x2b   :  { %270 = vmatpush3.msra.mxu0 %v54_v23  ;;  %322 = vmatpush3.msra.mxu1 %v86_v24  ;;  %v78_v50 = vld [vmem:[#allocation5 + $0x100] sm:$0xff] }
  0x2c   :  { %271 = vmatprep.subr.mxu0 %v69_v25  ;;  %323 = vmatprep.subr.mxu1 %v420_v0  ;;  %v43_v57 = vld [vmem:[#allocation7] sm:$0xf] }
  0x2d   :  { %272 = vmatpush3.msra.mxu0 %v53_v26  ;;  %324 = vmatpush3.msra.mxu1 %v85_v27 }
  0x2e   :  { %273 = vmatprep.subr.mxu0 %v68_v28  ;;  %325 = vmatprep.subr.mxu1 %v420_v0 }
  0x2f   :  { %274 = vmatpush3.msra.mxu0 %v52_v29  ;;  %326 = vmatpush3.msra.mxu1 %v84_v30 }
  0x30   :  { %275 = vmatprep.subr.mxu0 %v67_v31  ;;  %327 = vmatprep.subr.mxu1 %v420_v0 }
  0x31   :  { %276 = vmatpush3.msra.mxu0 %v51_v32  ;;  %328 = vmatpush3.msra.mxu1 %v83_v33 }
  0x32   :  { %277 = vmatprep.subr.mxu0 %v66_v34  ;;  %329 = vmatprep.subr.mxu1 %v420_v0 }
  0x33   :  { %278 = vmatpush3.msra.mxu0 %v50_v35  ;;  %330 = vmatpush3.msra.mxu1 %v82_v36 }
  0x34   :  { %279 = vmatprep.subr.mxu0 %v65_v37  ;;  %331 = vmatprep.subr.mxu1 %v420_v0 }
  0x35   :  { %280 = vmatpush3.msra.mxu0 %v49_v38  ;;  %332 = vmatpush3.msra.mxu1 %v81_v39 }
  0x36   :  { %281 = vmatprep.subr.mxu0 %v64_v41  ;;  %333 = vmatprep.subr.mxu1 %v420_v0 }
  0x37   :  { %282 = vmatpush3.msra.mxu0 %v48_v42  ;;  %334 = vmatpush3.msra.mxu1 %v80_v43 }
  0x38   :  { %283 = vmatprep.subr.mxu0 %v63_v44  ;;  %335 = vmatprep.subr.mxu1 %v420_v0 }
  0x39   :  { %284 = vmatpush3.msra.mxu0 %v47_v46  ;;  %161 = vmatprep.mubr.f32.mxu0 %v95_v45 }
  0x3a   :  { %285 = vmatprep.subr.mxu0 %v62_v47  ;;  %336 = vmatpush3.msra.mxu1 %v79_v48 }
  0x3b   :  { %286 = vmatpush3.msra.mxu0 %v46_v49  ;;  %337 = vmatprep.subr.mxu1 %v420_v0 }
  0x3c   :  { %162 = vmatmul.mubr.f32.vlgmr.msra.gmra.mxu0 %v44_v40  ;;  %338 = vmatpush3.msra.mxu1 %v78_v50 }
  0x3d   :  { %340 = vmatmul.mubr.f32.vlgmr.msra.gmra.mxu1 %v45_v51 }
  0xfc   :  { %v287_v52 = vpop.f32.mrf.mxu0 }
  0xfd   :  { %v233_v53 = vpop.f32.mrf.mxu1 }
  0xfe   :  { %v288_v54 = vpop.f32.mrf.mxu0 }
  0xff   :  { %v289_v55 = vadd.f32 %v288_v54, %v287_v52  ;;  %v341_v56 = vpop.f32.mrf.mxu1 }
 0x101   :  { %v234_v58 = vadd.f32 %v289_v55, %v233_v53 }
 0x103   :  { %v237_v59 = vadd.f32 %v234_v58, %v43_v57 }
 0x105   :  { %238 = vst [vmem:[#allocation7] sm:$0xf] %v237_v59 }
 0x106   :  { %401 = shalt.err (!%p398_p0)
}
 0x107   :  { %248 = dma.vmem_to_hbm [thread:$0]  %s246_s1, 64, %s467_s2, [#allocation4]  }
 0x108   :  { %414 = dma.done.wait [#allocation4], 64  }
 0x109   :  { %415 = vsyncadd [#allocation4], 4294967232 }
 0x10a   :  { %252 = vsyncpa [#allocation3], 1 }
 0x10b   :  { %253 = vsyncpa [#allocation6], 1 }
 0x10c   :  { %254 = vsyncpa [#allocation4], 1 }

</bundles_post_ra>
